<compile_context>
chip_gen: v7x
topology: tpu7x:2x2x1
jax: 0.10.0
libtpu: 0.0.40
codegen_flags: <defaults>
</compile_context>

<pallas_src>
import functools

import jax
import jax.numpy as jnp
from jax.experimental import pallas as pl
from jax.experimental.pallas import tpu as pltpu


def _round_up(v, m):
    return (v + m - 1) // m * m


def _mlp_body(x_ref, w1_ref, b1_ref, w2_ref, b2_ref):
    """fc1 + ReLU + (dropout p=0 -> identity) + fc2 + ReLU for one row tile.

    bf16 operands on the MXU, f32 accumulation, f32 elementwise."""
    xb = x_ref[...].astype(jnp.bfloat16)
    h = jnp.dot(xb, w1_ref[...], preferred_element_type=jnp.float32)
    h = jnp.maximum(h + b1_ref[...], 0.0)
    y = jnp.dot(h.astype(jnp.bfloat16), w2_ref[...],
                preferred_element_type=jnp.float32)
    return jnp.maximum(y + b2_ref[...], 0.0)


def _stats_kernel(x_ref, w1_ref, b1_ref, w2_ref, b2_ref,
                  psum_ref, psq_ref, *, tile_m, m_total):
    """Pass 1: per-tile partial sum / sum-of-squares for GLOBAL BatchNorm stats."""
    y = _mlp_body(x_ref, w1_ref, b1_ref, w2_ref, b2_ref)
    # Rows >= m_total are zero-padding added by the wrapper -> mask them out.
    row = pl.program_id(0) * tile_m + jax.lax.broadcasted_iota(
        jnp.int32, (tile_m, 1), 0)
    valid = (row < m_total).astype(jnp.float32)
    yv = y * valid
    psum_ref[0] = jnp.sum(yv, axis=0, keepdims=True)
    psq_ref[0] = jnp.sum(yv * yv, axis=0, keepdims=True)


def _apply_kernel(x_ref, w1_ref, b1_ref, w2_ref, b2_ref,
                  scale_ref, shift_ref, o_ref):
    """Pass 2: recompute the MLP and apply the folded BN scale/shift (one FMA)."""
    y = _mlp_body(x_ref, w1_ref, b1_ref, w2_ref, b2_ref)
    o_ref[...] = (y * scale_ref[...] + shift_ref[...]).astype(o_ref.dtype)


def mlp_forward(x, w1, b1, w2, b2, gamma, beta, *, eps=1e-5, tile_m=1024):
    """x: (B, T, input_dim) f32; w1: (in, hidden); w2: (hidden, out);
    b1/b2/gamma/beta: 1-D. Returns (B, T, output_dim) f32."""
    B, T, D_in = x.shape
    H = w1.shape[1]
    D_out = w2.shape[1]
    M = B * T

    # Row tiling: multiple of 8 (f32 sublane).  Large tiles amortize per-step
    # overhead; when M is big enough, keep >= 2 tiles so v7x megacore has work
    # for both TensorCores.
    TM = max(8, min(tile_m, _round_up(M, 8)))
    if _round_up(M, TM) // TM < 2 and M >= 256:
        TM = _round_up((M + 1) // 2, 8)
    Mp = _round_up(M, TM)
    n_tiles = Mp // TM

    # Row-pad x once (zeros); stays f32 — the bf16 cast happens inside the kernel.
    x2d = jnp.pad(x.reshape(M, D_in).astype(jnp.float32), ((0, Mp - M), (0, 0)))
    # Weights/biases are tiny and VMEM-resident; matmul operands pre-cast to bf16.
    w1b = w1.astype(jnp.bfloat16)
    w2b = w2.astype(jnp.bfloat16)
    b1f = b1.reshape(1, H).astype(jnp.float32)
    b2f = b2.reshape(1, D_out).astype(jnp.float32)
    gammaf = gamma.reshape(1, D_out).astype(jnp.float32)
    betaf = beta.reshape(1, D_out).astype(jnp.float32)

    cparams = pltpu.CompilerParams(
        dimension_semantics=("parallel",),       # both TCs on v7x take row tiles
        vmem_limit_bytes=32 * 1024 * 1024,       # fits v5e/v6e default & v7x physical
    )

    # All weight/bias/vector BlockSpecs use full-array feature dims (block dim ==
    # full array dim is always legal), so no feature padding is needed anywhere.
    weight_specs = [
        pl.BlockSpec((D_in, H), lambda i: (0, 0)),
        pl.BlockSpec((1, H), lambda i: (0, 0)),
        pl.BlockSpec((H, D_out), lambda i: (0, 0)),
        pl.BlockSpec((1, D_out), lambda i: (0, 0)),
    ]
    x_spec = pl.BlockSpec((TM, D_in), lambda i: (i, 0))

    # ---- Pass 1: statistics only (no y written to HBM). ----
    stats = functools.partial(_stats_kernel, tile_m=TM, m_total=M)
    psum, psq = pl.pallas_call(
        stats,
        out_shape=(
            jax.ShapeDtypeStruct((n_tiles, 1, D_out), jnp.float32),
            jax.ShapeDtypeStruct((n_tiles, 1, D_out), jnp.float32),
        ),
        grid=(n_tiles,),
        in_specs=[x_spec] + weight_specs,
        out_specs=(
            pl.BlockSpec((1, 1, D_out), lambda i: (i, 0, 0)),
            pl.BlockSpec((1, 1, D_out), lambda i: (i, 0, 0)),
        ),
        compiler_params=cparams,
    )(x2d, w1b, b1f, w2b, b2f)

    # Fold global BatchNorm statistics into a per-feature scale/shift (tiny, O(D_out)).
    total = jnp.sum(psum, axis=0)                    # (1, D_out)
    totsq = jnp.sum(psq, axis=0)                     # (1, D_out)
    mean = total / M
    var = jnp.maximum(totsq / M - mean * mean, 0.0)  # biased variance (BN training mode)
    scale = jax.lax.rsqrt(var + eps) * gammaf
    shift = betaf - mean * scale

    # ---- Pass 2: recompute the MLP and write the normalized output once. ----
    out = pl.pallas_call(
        _apply_kernel,
        out_shape=jax.ShapeDtypeStruct((Mp, D_out), jnp.float32),
        grid=(n_tiles,),
        in_specs=[x_spec] + weight_specs + [
            pl.BlockSpec((1, D_out), lambda i: (0, 0)),
            pl.BlockSpec((1, D_out), lambda i: (0, 0)),
        ],
        out_specs=pl.BlockSpec((TM, D_out), lambda i: (i, 0)),
        compiler_params=cparams,
    )(x2d, w1b, b1f, w2b, b2f, scale, shift)

    return out[:M].reshape(B, T, D_out)


def init_params(key, input_dim, hidden_dim, output_dim):
    """Matches MLP.init_weights (xavier_normal_ weights, bias=0.1, BN gamma=1, beta=0).
    Linear weights stored pre-transposed as (in, out)."""
    k1, k2 = jax.random.split(key)
    std1 = (2.0 / (input_dim + hidden_dim)) ** 0.5
    std2 = (2.0 / (hidden_dim + output_dim)) ** 0.5
    w1 = std1 * jax.random.normal(k1, (input_dim, hidden_dim), dtype=jnp.float32)
    w2 = std2 * jax.random.normal(k2, (hidden_dim, output_dim), dtype=jnp.float32)
    b1 = jnp.full((hidden_dim,), 0.1, dtype=jnp.float32)
    b2 = jnp.full((output_dim,), 0.1, dtype=jnp.float32)
    gamma = jnp.ones((output_dim,), dtype=jnp.float32)
    beta = jnp.zeros((output_dim,), dtype=jnp.float32)
    return w1, b1, w2, b2, gamma, beta


if __name__ == "__main__":
    # Small shapes; T chosen so M=18 exercises row padding/masking, and tile_m=16
    # exercises multiple row tiles + the cross-tile BatchNorm reduction.
    B, T = 2, 9
    input_dim, hidden_dim, output_dim = 32, 32, 16

    key = jax.random.PRNGKey(0)
    kx, kp = jax.random.split(key)
    x = jax.random.normal(kx, (B, T, input_dim), dtype=jnp.float32)
    w1, b1, w2, b2, gamma, beta = init_params(kp, input_dim, hidden_dim, output_dim)

    out = mlp_forward(x, w1, b1, w2, b2, gamma, beta, tile_m=16)
    jax.block_until_ready(out)

    # Pure-JAX reference with matching numerics (bf16 MXU operands, f32 accumulate).
    x2 = x.reshape(-1, input_dim)
    h_ref = jnp.maximum(
        jnp.dot(x2.astype(jnp.bfloat16), w1.astype(jnp.bfloat16),
                preferred_element_type=jnp.float32) + b1, 0.0)
    y_ref = jnp.maximum(
        jnp.dot(h_ref.astype(jnp.bfloat16), w2.astype(jnp.bfloat16),
                preferred_element_type=jnp.float32) + b2, 0.0)
    mu = y_ref.mean(axis=0, keepdims=True)
    var = ((y_ref - mu) ** 2).mean(axis=0, keepdims=True)
    ref = ((y_ref - mu) * jax.lax.rsqrt(var + 1e-5) * gamma + beta).reshape(
        B, T, output_dim)

    assert jnp.allclose(out, ref, atol=2e-3, rtol=2e-3), "mismatch vs reference"

    print("KERNEL_OK")
</pallas_src>

<mosaic_0001>
module attributes {stable_mosaic.version = 11 : i64} {
  func.func @_stats_kernel(%arg0: i32, %arg1: memref<16x32xf32, #tpu.memory_space<vmem>>, %arg2: memref<32x32xbf16, #tpu.memory_space<vmem>>, %arg3: memref<1x32xf32, #tpu.memory_space<vmem>>, %arg4: memref<32x16xbf16, #tpu.memory_space<vmem>>, %arg5: memref<1x16xf32, #tpu.memory_space<vmem>>, %arg6: memref<1x1x16xf32, #tpu.memory_space<vmem>>, %arg7: memref<1x1x16xf32, #tpu.memory_space<vmem>>) attributes {dimension_semantics = [#tpu.dimension_semantics<parallel>], iteration_bounds = array<i64: 2>, scalar_prefetch = 0 : i64, scratch_operands = 0 : i64, tpu.core_type = #tpu.core_type<tc>, window_params = [{transform_indices = @transform_0, window_bounds = array<i64: 16, 32>}, {pipeline_mode = #tpu.pipeline_mode<synchronous>, transform_indices = @transform_1, window_bounds = array<i64: 32, 32>}, {pipeline_mode = #tpu.pipeline_mode<synchronous>, transform_indices = @transform_2, window_bounds = array<i64: 1, 32>}, {pipeline_mode = #tpu.pipeline_mode<synchronous>, transform_indices = @transform_3, window_bounds = array<i64: 32, 16>}, {pipeline_mode = #tpu.pipeline_mode<synchronous>, transform_indices = @transform_4, window_bounds = array<i64: 1, 16>}, {transform_indices = @transform_5, window_bounds = array<i64: 1, 1, 16>}, {transform_indices = @transform_6, window_bounds = array<i64: 1, 1, 16>}]} {
    %c0 = arith.constant 0 : index
    %c0_0 = arith.constant 0 : index
    %0 = vector.load %arg1[%c0, %c0_0] : memref<16x32xf32, #tpu.memory_space<vmem>>, vector<16x32xf32>
    %1 = arith.truncf %0 : vector<16x32xf32> to vector<16x32xbf16>
    %c0_1 = arith.constant 0 : index
    %c0_2 = arith.constant 0 : index
    %2 = vector.load %arg2[%c0_1, %c0_2] : memref<32x32xbf16, #tpu.memory_space<vmem>>, vector<32x32xbf16>
    %cst = arith.constant dense<0.000000e+00> : vector<16x32xf32>
    %3 = tpu.matmul %1, %2, %cst {dimension_numbers = #tpu.dot_dimension_numbers<[1], [0], [0], [1], [0, 0, 1, 1], [], []>} : vector<16x32xbf16>, vector<32x32xbf16>, vector<16x32xf32> -> vector<16x32xf32>
    %c0_3 = arith.constant 0 : index
    %c0_4 = arith.constant 0 : index
    %4 = vector.load %arg3[%c0_3, %c0_4] : memref<1x32xf32, #tpu.memory_space<vmem>>, vector<1x32xf32>
    %5 = vector.broadcast %4 : vector<1x32xf32> to vector<16x32xf32>
    %6 = arith.addf %3, %5 : vector<16x32xf32>
    %cst_5 = arith.constant 0.000000e+00 : f32
    %7 = vector.broadcast %cst_5 : f32 to vector<16x32xf32>
    %8 = arith.maximumf %6, %7 : vector<16x32xf32>
    %9 = arith.truncf %8 : vector<16x32xf32> to vector<16x32xbf16>
    %c0_6 = arith.constant 0 : index
    %c0_7 = arith.constant 0 : index
    %10 = vector.load %arg4[%c0_6, %c0_7] : memref<32x16xbf16, #tpu.memory_space<vmem>>, vector<32x16xbf16>
    %cst_8 = arith.constant dense<0.000000e+00> : vector<16x16xf32>
    %11 = tpu.matmul %9, %10, %cst_8 {dimension_numbers = #tpu.dot_dimension_numbers<[1], [0], [0], [1], [0, 0, 1, 1], [], []>} : vector<16x32xbf16>, vector<32x16xbf16>, vector<16x16xf32> -> vector<16x16xf32>
    %c0_9 = arith.constant 0 : index
    %c0_10 = arith.constant 0 : index
    %12 = vector.load %arg5[%c0_9, %c0_10] : memref<1x16xf32, #tpu.memory_space<vmem>>, vector<1x16xf32>
    %13 = vector.broadcast %12 : vector<1x16xf32> to vector<16x16xf32>
    %14 = arith.addf %11, %13 : vector<16x16xf32>
    %cst_11 = arith.constant 0.000000e+00 : f32
    %15 = vector.broadcast %cst_11 : f32 to vector<16x16xf32>
    %16 = arith.maximumf %14, %15 : vector<16x16xf32>
    %c16_i32 = arith.constant 16 : i32
    %17 = arith.muli %arg0, %c16_i32 : i32
    %18 = tpu.iota {dimensions = array<i32: 0>} : vector<16x1xi32>
    %19 = vector.broadcast %17 : i32 to vector<16x1xi32>
    %20 = arith.addi %19, %18 : vector<16x1xi32>
    %c18_i32 = arith.constant 18 : i32
    %21 = vector.broadcast %c18_i32 : i32 to vector<16x1xi32>
    %22 = arith.cmpi slt, %20, %21 : vector<16x1xi32>
    %23 = arith.extui %22 : vector<16x1xi1> to vector<16x1xi32>
    %24 = arith.sitofp %23 : vector<16x1xi32> to vector<16x1xf32>
    %25 = vector.broadcast %24 : vector<16x1xf32> to vector<16x16xf32>
    %26 = arith.mulf %16, %25 : vector<16x16xf32>
    %cst_12 = arith.constant dense<0.000000e+00> : vector<16xf32>
    %27 = vector.multi_reduction <add>, %26, %cst_12 [0] : vector<16x16xf32> to vector<16xf32>
    %28 = vector.shape_cast %27 : vector<16xf32> to vector<1x16xf32>
    %c0_13 = arith.constant 0 : index
    %c0_14 = arith.constant 0 : index
    %c0_15 = arith.constant 0 : index
    %29 = vector.load %arg6[%c0_13, %c0_14, %c0_15] : memref<1x1x16xf32, #tpu.memory_space<vmem>>, vector<1x1x16xf32>
    %30 = vector.shape_cast %29 : vector<1x1x16xf32> to vector<1x16xf32>
    %31 = vector.shape_cast %28 : vector<1x16xf32> to vector<1x1x16xf32>
    tpu.vector_store %arg6[%c0_13, %c0_14, %c0_15], %31 {strides = array<i32>} : memref<1x1x16xf32, #tpu.memory_space<vmem>>, vector<1x1x16xf32>,
    %32 = arith.mulf %26, %26 : vector<16x16xf32>
    %cst_16 = arith.constant dense<0.000000e+00> : vector<16xf32>
    %33 = vector.multi_reduction <add>, %32, %cst_16 [0] : vector<16x16xf32> to vector<16xf32>
    %34 = vector.shape_cast %33 : vector<16xf32> to vector<1x16xf32>
    %c0_17 = arith.constant 0 : index
    %c0_18 = arith.constant 0 : index
    %c0_19 = arith.constant 0 : index
    %35 = vector.load %arg7[%c0_17, %c0_18, %c0_19] : memref<1x1x16xf32, #tpu.memory_space<vmem>>, vector<1x1x16xf32>
    %36 = vector.shape_cast %35 : vector<1x1x16xf32> to vector<1x16xf32>
    %37 = vector.shape_cast %34 : vector<1x16xf32> to vector<1x1x16xf32>
    tpu.vector_store %arg7[%c0_17, %c0_18, %c0_19], %37 {strides = array<i32>} : memref<1x1x16xf32, #tpu.memory_space<vmem>>, vector<1x1x16xf32>,
    return
  }
  func.func @transform_0(%arg0: i32) -> (i32, i32) {
    %c0_i32 = arith.constant 0 : i32
    %c0_i32_0 = arith.constant 0 : i32
    return %arg0, %c0_i32 : i32, i32
  }
  func.func @transform_1(%arg0: i32) -> (i32, i32) {
    %c0_i32 = arith.constant 0 : i32
    %c0_i32_0 = arith.constant 0 : i32
    %c0_i32_1 = arith.constant 0 : i32
    return %c0_i32, %c0_i32_0 : i32, i32
  }
  func.func @transform_2(%arg0: i32) -> (i32, i32) {
    %c0_i32 = arith.constant 0 : i32
    %c0_i32_0 = arith.constant 0 : i32
    %c0_i32_1 = arith.constant 0 : i32
    return %c0_i32, %c0_i32_0 : i32, i32
  }
  func.func @transform_3(%arg0: i32) -> (i32, i32) {
    %c0_i32 = arith.constant 0 : i32
    %c0_i32_0 = arith.constant 0 : i32
    %c0_i32_1 = arith.constant 0 : i32
    return %c0_i32, %c0_i32_0 : i32, i32
  }
  func.func @transform_4(%arg0: i32) -> (i32, i32) {
    %c0_i32 = arith.constant 0 : i32
    %c0_i32_0 = arith.constant 0 : i32
    %c0_i32_1 = arith.constant 0 : i32
    return %c0_i32, %c0_i32_0 : i32, i32
  }
  func.func @transform_5(%arg0: i32) -> (i32, i32, i32) {
    %c0_i32 = arith.constant 0 : i32
    %c0_i32_0 = arith.constant 0 : i32
    %c0_i32_1 = arith.constant 0 : i32
    return %arg0, %c0_i32, %c0_i32_0 : i32, i32, i32
  }
  func.func @transform_6(%arg0: i32) -> (i32, i32, i32) {
    %c0_i32 = arith.constant 0 : i32
    %c0_i32_0 = arith.constant 0 : i32
    %c0_i32_1 = arith.constant 0 : i32
    return %arg0, %c0_i32, %c0_i32_0 : i32, i32, i32
  }
}

</mosaic_0001>

<bundles_post_ra>
// kernel: tpu_custom_call.1
= control target key start
LH: loop header
LB: loop body
LE: loop exit
PB: predicated region body
PF: predicated region fallthrough
CT: control target
= control target key end

     0   :  { %12 = vsyncpa [#allocation3], 0  ;;  %s1086_s0 = inlined_call_operand.hbm [shape: f32[32,32], index: 0, kind: input, shape index: {}]   ;;  %s1087_s1 = inlined_call_operand.vmem [shape: bf16[32,32], index: 1, kind: input, shape index: {}]   ;;  %s1088_s2 = inlined_call_operand.vmem [shape: f32[1,32], index: 2, kind: input, shape index: {}]   ;;  %s1089_s3 = inlined_call_operand.vmem [shape: bf16[32,16], index: 3, kind: input, shape index: {}]   ;;  %s1090_s4 = inlined_call_operand.vmem [shape: f32[1,16], index: 4, kind: input, shape index: {}]   ;;  %s1091_s5 = inlined_call_operand.hbm [shape: f32[2,1,16], index: 5, kind: output, shape index: {0}]   ;;  %s1092_s6 = inlined_call_operand.hbm [shape: f32[2,1,16], index: 6, kind: output, shape index: {1}]  }
   0x1   :  { %14 = vsyncpa [#allocation3 + $0x1], 0 }
   0x2   :  { %15 = vsyncpa [#allocation4], 0 }
   0x3   :  { %17 = vsyncpa [#allocation4 + $0x1], 0 }
   0x4   :  { %18 = vsyncpa [#allocation7], 0 }
   0x5   :  { %20 = vsyncpa [#allocation7 + $0x1], 0  ;;  %s864_s21 = smov 0   ;;  %s866_s22 = smov 0  }
   0x6   :  { %s868_s23 = smov 0   ;;  %s870_s24 = smov 0  }
   0x7 LB: > { %s885_s25 = sadd.s32 4294967295, %s820_s24   ;;  %s587_s26 = sadd.s32 4294967294, %s820_s24   ;;  %s820_s24 = sphi %s870_s24, %s1105_s24   ;;  %s816_s23 = sphi %s868_s23, %s1104_s23   ;;  %s812_s22 = sphi %s866_s22, %s1103_s22   ;;  %s808_s21 = sphi %s864_s21, %s1102_s21  }
   0x8   : > { %s889_s27 = sadd.s32 1, %s820_s24   ;;  %s33_s28 = sadd.s32 1, %s816_s23 }
   0x9   : > { %s30_s29 = ssub.s32 %s820_s24, %s889_s27  ;;  %p40_p0 = scmp.ne.s32.totalorder %s816_s23, %s812_s22 }
   0xa   : > { %p31_p1 = scmp.eq.s32.totalorder %s30_s29, 0  ;;  %p41_p2 = scmp.eq.s32.totalorder %s820_s24, 0 }
   0xb   : > { %p46_p3 = scmp.ne.s32.totalorder %s812_s22, %s808_s21  ;;  %p47_p4 = scmp.eq.s32.totalorder %s885_s25, 0 }
   0xc   : > { %s901_s30 = scalar_select %p31_p1, %s816_s23, %s33_s28  }
   0xd   : > { %p903_p5 = por %p41_p2, %p40_p0  ;;  %p907_p6 = por %p47_p4, %p46_p3 }
   0xe   : > { %p154_p7 = scmp.eq.s32.totalorder %s885_s25, 1  ;;  %p160_p8 = scmp.eq.s32.totalorder %s587_s26, 1 }
   0xf   : > { %p650_p10 = scmp.lt.s32.totalorder %s820_s24, 2  ;;  %s218_s11 = sand.u32 1, %s816_s23  }
  0x10   : > { %p914_p11 = por %p154_p7, %p40_p0  ;;  %p918_p12 = por %p160_p8, %p46_p3 }
  0x11   : > { %s610_s12 = sshll.u32 %s820_s24, 8  ;;  %s590_s13 = sshll.u32 %s218_s11, 4 }
  0x12   : > { %s1096_s9 = scalar_select %p914_p11, 1, 0 }
  0x13   : > { %s1097_s10 = scalar_select %p918_p12, 1, 0 }
  0x14   : > { %s927_s16 = scalar_lea.hbm %s1086_s0, %s610_s12  ;;  %s222_s17 = scalar_lea.vmem [#allocation2], %s590_s13 }
  0x15   : > { %s229_s18 = sshll.u32 %s222_s17, 4  ;;  %p931_p13 = pnand %p650_p10, %p903_p5  ;;  %s935_s18 = int_to_ptr.vmem [resolvable:$true] %s229_s18 }
  0x16   : > { %s937_s20 = scalar_lea.sflag [#allocation3], %s218_s11  ;;  %s692_s26 = scalar_lea.hbm %s927_s16, 256 }
  0x17   : > { %p693_p0 = scmp.ne.s32.totalorder %s927_s16, %s692_s26  ;;  %p694_p1 = pneg %p931_p13 }
  0x18   : > { %s697_s7 = scalar_lea.hbm %s1086_s0, 512  ;;  %p698_p4 = scmp.lt.u32.totalorder %s927_s16, %s1086_s0 }
  0x19   : > { %p695_p2 = pnand %p694_p1, %p693_p0  ;;  %p699_p5 = scmp.lt.u32.totalorder %s697_s7, %s692_s26 }
  0x1a   : > { %p701_p8 = scmp.lt.u32.totalorder %s692_s26, %s927_s16 }
  0x1b   : > { %p696_p3 = pneg %p695_p2  ;;  %p700_p7 = por %p699_p5, %p698_p4 }
  0x1d   : > { %p702_p10 = por %p701_p8, %p700_p7 }
  0x1f   : > { %p703_p9 = pnand %p702_p10, %p696_p3 }
  0x21   : > { %706 = shalt.err (!%p703_p9)
}
  0x22   : > { %s707_s11 = scalar_lea.vmem %s935_s18, 256  ;;  %s822_s14 = smov [#allocation2]  }
  0x23   : > { %p708_p0 = scmp.ne.s32.totalorder %s935_s18, %s707_s11  ;;  %s712_s15 = sshll.u32 %s822_s14, 4  ;;  %s713_s15 = int_to_ptr.vmem [resolvable:$false] %s712_s15 }
  0x24   : > { %s714_s17 = scalar_lea.vmem %s713_s15, 512  ;;  %p715_p11 = scmp.lt.s32.totalorder %s935_s18, %s713_s15 }
  0x25   : > { %p710_p2 = pnand %p708_p0, %p694_p1  ;;  %p716_p4 = scmp.lt.s32.totalorder %s714_s17, %s707_s11 }
  0x27   : > { %p711_p12 = pneg %p710_p2  ;;  %p717_p5 = por %p716_p4, %p715_p11 }
  0x29   : > { %p718_p7 = pnand %p717_p5, %p711_p12 }
  0x2b   : > { %721 = shalt.err (!%p718_p7)
}
  0x2c   : > { %s823_s26 = smov 128   ;;  %s824_s28 = smov 8  }
  0x2d   : > { %642 = dma.hbm_to_vmem [thread:$0]  (!%p931_p13), %s927_s16, 256, %s935_s18, %s937_s20, %s823_s26, %s823_s26, %s824_s28  }
  0x2e   : > { %p593_p9 = scmp.ge.s32.totalorder %s820_s24, 1  ;;  %p237_p1 = scmp.lt.s32.totalorder %s820_s24, 3 }
  0x30   : > { %p238_p3 = pnand %p593_p9, %p237_p1 }
  0x31   : > { %s968_s29 = sand.u32 (!%p238_p3), 1, %s812_s22  }
  0x32   : > { %241 = sbr.rel (%p238_p3) target bundleno = 560 (0x230), region = 40  ;;  %s594_s7 = sshll.u32 (!%p238_p3), %s968_s29, 4 }
  0x33   : > { %s244_s12 = scalar_lea.sflag (!%p238_p3), [#allocation3], %s968_s29  ;;  %s247_s13 = scalar_lea.vmem (!%p238_p3), [#allocation2], %s594_s7 }
  0x39   : > { %795 = dma.done.wait (%p907_p6), %s244_s12, 256  }
  0x3a   : > { %797 = vsyncadd (%p907_p6), %s244_s12, 4294967040  ;;  %v825_v0 = vmov 0.0   ;;  %vm826_vm0 = vmmov 0   ;;  %v688_v1 = vld [vmem:[%s1087_s1] sm:$0xff]   ;;  %v689_v2 = vld [vmem:[%s1087_s1 + $0x8] sm:$0xff]   ;;  %vm307_vm1 = vcmask 261120   ;;  %v425_v18 = vlaneseq }
  0x3b   : > { %617 = vmatprep.subr.bf16.mxu0 %v825_v0  ;;  %621 = vmatprep.mubr.msk.bf16.mxu0 %vm826_vm0, %v825_v0  ;;  %v281_v3 = vld [vmem:[%s247_s13] sm:$0xff]  ;;  %v282_v4 = vld [vmem:[%s247_s13 + $0x8] sm:$0xff]  ;;  %s994_s28 = sshll.u32 %s885_s25, 4  ;;  %vm439_vm4 = vcmask 130048   ;;  %s272_s25 = scalar_lea.vmem [#allocation5], %s968_s29  ;;  %vm449_vm5 = vcmask 122880  }
  0x3c   : > { %625 = vmatprep.subr.bf16.mxu1 %v825_v0  ;;  %629 = vmatprep.mubr.msk.bf16.mxu1 %vm826_vm0, %v825_v0  ;;  %v283_v5 = vpack.c.bf16 %v282_v4, %v281_v3  ;;  %v690_v6 = vld [vmem:[%s1089_s3] sm:$0xff]   ;;  %v691_v7 = vld [vmem:[%s1089_s3 + $0x8] sm:$0xff]   ;;  %v426_v19 = vshrl.u32 %v425_v18, 7  ;;  %v428_v20 = vstv %s994_s28  ;;  %s480_s13 = sshll.u32 %s272_s25, 4  ;;  %s278_s16 = scalar_lea.vmem [#allocation6], %s968_s29  ;;  %s1010_s13 = int_to_ptr.vmem [resolvable:$true] %s480_s13 }
  0x3d   : > { %618 = vmatpush3.bf16.msra.mxu0 %v688_v1  ;;  %626 = vmatpush3.bf16.msra.mxu1 %v690_v6  ;;  %v595_v8 = vld [vmem:[%s1088_s2] ss:$0 sm:$0xff]  ;;  %s493_s18 = sshll.u32 %s278_s16, 4  ;;  %s1008_s8 = scalar_lea.hbm %s1091_s5, %s994_s28  ;;  %s1019_s18 = int_to_ptr.vmem [resolvable:$true] %s493_s18 }
  0x3e   : > { %619 = vmatprep.subr.bf16.mxu0 %v825_v0  ;;  %627 = vmatprep.subr.bf16.mxu1 %v825_v0  ;;  %v427_v21 = vadd.s32 8, %v426_v19  ;;  %v429_v22 = vadd.s32 %v428_v20, %v426_v19  ;;  %v599_v24 = vld [vmem:[%s1090_s4] ss:$0 sm:$0xff]  ;;  %s1017_s15 = scalar_lea.hbm %s1092_s6, %s994_s28  ;;  %s464_s17 = scalar_lea.sflag [#allocation4], %s968_s29 }
  0x3f   : > { %s722_s26 = scalar_lea.vmem %s1010_s13, 16  ;;  %p1099_p11 = scmp.ne.s32.totalorder %s1096_s9, 0 }
  0x40   : > { %v430_v23 = vadd.s32 %v428_v20, %v427_v21  ;;  %vm431_vm2 = vcmp.lt.s32.totalorder %v429_v22, 18  ;;  %p723_p6 = scmp.ne.s32.totalorder %s1010_s13, %s722_s26  ;;  %s827_s7 = smov [#allocation5]  }
  0x41   : > { %620 = vmatpush3.bf16.msra.mxu0 %v689_v2  ;;  %628 = vmatpush3.bf16.msra.mxu1 %v691_v7  ;;  %v604_v28 = vsel %vm431_vm2, 1.0, %v825_v0  ;;  %s726_s12 = sshll.u32 %s827_s7, 4  ;;  %s727_s12 = int_to_ptr.vmem [resolvable:$false] %s726_s12 }
  0x42   : > { %vm432_vm3 = vcmp.lt.s32.totalorder %v430_v23, 18  ;;  %p724_p12 = pnand %p723_p6, %p1099_p11  ;;  %s728_s19 = scalar_lea.vmem %s727_s12, 32 }
  0x43   : > { %v605_v33 = vsel %vm432_vm3, 1.0, %v825_v0  ;;  %p729_p8 = scmp.lt.s32.totalorder %s1010_s13, %s727_s12  ;;  %p730_p10 = scmp.lt.s32.totalorder %s728_s19, %s722_s26 }
  0x44   : > { %622 = vmatmul.mubr.msk.bf16.vlgmr.msra.gmra.mrb[0].mxu0 %vm307_vm1, %v283_v5  ;;  %p725_p13 = pneg %p724_p12 }
  0x45   : > { %p731_p0 = por %p730_p10, %p729_p8 }
  0x47   : > { %p732_p2 = pnand %p731_p0, %p725_p13 }
 0x117   : > { %v345_v9 = vpop.f32.mrb[0].mxu0 }
 0x118   : > { %v346_v10 = vadd.f32 %v595_v8, %v345_v9  ;;  %v623_v11 = vpop.f32.mrb[1].mxu0 }
 0x119   : > { %v348_v12 = vpop.f32.mrb[2].mxu0 }
 0x11a   : > { %v349_v13 = vadd.f32 %v595_v8, %v348_v12  ;;  %v624_v14 = vpop.f32.mrb[3].mxu0  ;;  %v352_v15 = vmax.f32 %v346_v10, 0.0 }
 0x11c   : > { %v353_v16 = vmax.f32 %v349_v13, 0.0 }
 0x11e   : > { %v354_v17 = vpack.c.bf16 %v353_v16, %v352_v15 }
 0x120   : > { %630 = vmatmul.mubr.msk.bf16.vlgmr.msra.gmra.mrb[0].mxu1 %vm307_vm1, %v354_v17 }
 0x1f3   : > { %v415_v25 = vpop.f32.mrb[0].mxu1 }
 0x1f4   : > { %v416_v26 = vadd.f32 %v599_v24, %v415_v25  ;;  %v631_v27 = vpop.f32.mrb[1].mxu1 }
 0x1f5   : > { %v418_v29 = vpop.f32.mrb[2].mxu1 }
 0x1f6   : > { %v422_v30 = vmax.f32 %v416_v26, 0.0  ;;  %v419_v31 = vadd.f32 %v599_v24, %v418_v29  ;;  %v632_v32 = vpop.f32.mrb[3].mxu1 }
 0x1f8   : > { %v437_v34 = vmul.f32 %v604_v28, %v422_v30  ;;  %v423_v35 = vmax.f32 %v419_v31, 0.0 }
 0x1fa   : > { %v451_v36 = vmul.f32 %v437_v34, %v437_v34  ;;  %v438_v37 = vmul.f32 %v605_v33, %v423_v35  ;;  %v440_v38 = vsel %vm439_vm4, %v437_v34, 0.0 }
 0x1fc   : > { %v441_v39 = vsel %vm439_vm4, %v438_v37, 0.0  ;;  %v452_v40 = vmul.f32 %v438_v37, %v438_v37  ;;  %v453_v42 = vsel %vm439_vm4, %v451_v36, 0.0 }
 0x1fd   : > { %v442_v41 = vadd.f32 %v441_v39, %v440_v38 }
 0x1fe   : > { %v454_v43 = vsel %vm439_vm4, %v452_v40, 0.0 }
 0x1ff   : > { %v443_v44 = vrot.slane %v442_v41, 4  ;;  %v455_v45 = vadd.f32 %v454_v43, %v453_v42 }
 0x201   : > { %v444_v46 = vadd.f32 %v443_v44, %v442_v41  ;;  %v456_v47 = vrot.slane %v455_v45, 4 }
 0x203   : > { %v445_v48 = vrot.slane %v444_v46, 2  ;;  %v457_v49 = vadd.f32 %v456_v47, %v455_v45 }
 0x205   : > { %v446_v50 = vadd.f32 %v445_v48, %v444_v46  ;;  %v458_v51 = vrot.slane %v457_v49, 2 }
 0x207   : > { %v447_v52 = vrot.slane %v446_v50, 1  ;;  %v459_v53 = vadd.f32 %v458_v51, %v457_v49 }
 0x209   : > { %v448_v54 = vadd.f32 %v447_v52, %v446_v50  ;;  %v460_v55 = vrot.slane %v459_v53, 1 }
 0x20b   : > { %450 = vst.msk [vmem:[%s272_s25] sm:$0x1] %vm449_vm5, %v448_v54  ;;  %v461_v56 = vadd.f32 %v460_v55, %v459_v53 }
 0x20c   : > { %735 = shalt.err (!%p732_p2)
}
 0x20d   : > { %s736_s28 = scalar_lea.hbm %s1008_s8, 16  ;;  %s740_s11 = scalar_lea.hbm %s1091_s5, 32 }
 0x20e   : > { %p737_p4 = scmp.ne.s32.totalorder %s1008_s8, %s736_s28  ;;  %p741_p9 = scmp.lt.u32.totalorder %s1008_s8, %s1091_s5 }
 0x20f   : > { %p742_p1 = scmp.lt.u32.totalorder %s740_s11, %s736_s28  ;;  %p744_p6 = scmp.lt.u32.totalorder %s736_s28, %s1008_s8 }
 0x210   : > { %p738_p5 = pnand %p737_p4, %p1099_p11 }
 0x211   : > { %p743_p3 = por %p742_p1, %p741_p9 }
 0x212   : > { %p739_p7 = pneg %p738_p5 }
 0x213   : > { %p745_p12 = por %p744_p6, %p743_p3 }
 0x215   : > { %p746_p13 = pnand %p745_p12, %p739_p7 }
 0x217   : > { %749 = shalt.err (!%p746_p13)
}
 0x218   : > { %635 = dma.vmem_to_hbm [thread:$0]  (%p1099_p11), %s1010_s13, 16, %s1008_s8, %s464_s17   ;;  %462 = vst.msk [vmem:[%s278_s16] sm:$0x1] %vm449_vm5, %v461_v56 }
 0x219   : > { %s468_s26 = scalar_lea.sflag [#allocation7], %s968_s29  ;;  %s750_s12 = scalar_lea.vmem %s1019_s18, 16 }
 0x21a   : > { %p751_p8 = scmp.ne.s32.totalorder %s1019_s18, %s750_s12  ;;  %s828_s19 = smov [#allocation6]  }
 0x21b   : > { %s754_s28 = sshll.u32 %s828_s19, 4  ;;  %s755_s28 = int_to_ptr.vmem [resolvable:$false] %s754_s28 }
 0x21c   : > { %p752_p10 = pnand %p751_p8, %p1099_p11  ;;  %s756_s25 = scalar_lea.vmem %s755_s28, 32 }
 0x21d   : > { %p757_p2 = scmp.lt.s32.totalorder %s1019_s18, %s755_s28  ;;  %p758_p4 = scmp.lt.s32.totalorder %s756_s25, %s750_s12 }
 0x21e   : > { %p753_p0 = pneg %p752_p10 }
 0x21f   : > { %p759_p5 = por %p758_p4, %p757_p2 }
 0x221   : > { %p760_p7 = pnand %p759_p5, %p753_p0 }
 0x223   : > { %763 = shalt.err (!%p760_p7)
}
 0x224   : > { %s764_s29 = scalar_lea.hbm %s1017_s15, 16  ;;  %s768_s8 = scalar_lea.hbm %s1092_s6, 32 }
 0x225   : > { %p765_p9 = scmp.ne.s32.totalorder %s1017_s15, %s764_s29  ;;  %p769_p6 = scmp.lt.u32.totalorder %s1017_s15, %s1092_s6 }
 0x226   : > { %p770_p12 = scmp.lt.u32.totalorder %s768_s8, %s764_s29  ;;  %p772_p8 = scmp.lt.u32.totalorder %s764_s29, %s1017_s15 }
 0x227   : > { %p766_p1 = pnand %p765_p9, %p1099_p11 }
 0x228   : > { %p771_p13 = por %p770_p12, %p769_p6 }
 0x229   : > { %p767_p3 = pneg %p766_p1 }
 0x22a   : > { %p773_p10 = por %p772_p8, %p771_p13 }
 0x22c   : > { %p774_p0 = pnand %p773_p10, %p767_p3 }
 0x22e   : > { %777 = shalt.err (!%p774_p0)
}
 0x22f   : > { %636 = dma.vmem_to_hbm [thread:$0]  (%p1099_p11), %s1019_s18, 16, %s1017_s15, %s468_s26  }
 0x230 PF: > { %s505_s11 = sand.u32 1, %s808_s21   ;;  %p1100_p2 = scmp.ne.s32.totalorder %s1097_s10, 0 }
 0x231   : > { %p1101_p4 = scmp.ge.s32.totalorder %s820_s24, 2  ;;  %s506_s14 = scalar_lea.sflag [#allocation4], %s505_s11 }
 0x233   : > { %p644_p5 = pnand %p1101_p4, %p1100_p2 }
 0x235   : > { %799 = dma.done.wait (!%p644_p5), %s506_s14, 16  }
 0x236   : > { %801 = vsyncadd (!%p644_p5), %s506_s14, 4294967280  ;;  %s514_s7 = scalar_lea.sflag [#allocation7], %s505_s11 }
 0x237   : > { %803 = dma.done.wait (!%p644_p5), %s514_s7, 16  }
 0x238   : > { %805 = vsyncadd (!%p644_p5), %s514_s7, 4294967280  ;;  %p23_p11 = scmp.ge.s32.totalorder %s889_s27, 4   ;;  %s1102_s21 = smov %s812_s22 }
 0x239   : > { %s1103_s22 = smov %s816_s23  ;;  %s1104_s23 = smov %s901_s30 }
 0x23a   : > { %s1105_s24 = smov %s889_s27  ;;  %25 = sbr.rel (!%p23_p11) target bundleno = 7 (0x7), region = 102 }
 0x241   :  { %518 = vsyncpa [#allocation3], 1 }
 0x242   :  { %520 = vsyncpa [#allocation3 + $0x1], 1 }
 0x243   :  { %521 = vsyncpa [#allocation4], 1 }
 0x244   :  { %523 = vsyncpa [#allocation4 + $0x1], 1 }
 0x245   :  { %524 = vsyncpa [#allocation7], 1 }
 0x246   :  { %526 = vsyncpa [#allocation7 + $0x1], 1 }

</bundles_post_ra>
